<compile_context>
chip_gen: v7x
topology: tpu7x:2x2x1
jax: 0.10.0
libtpu: 0.0.40
codegen_flags: <defaults>
</compile_context>

<pallas_src>
import functools

import jax
import jax.numpy as jnp
from jax import lax
from jax.experimental import pallas as pl
from jax.experimental.pallas import tpu as pltpu


def _conv3d_tile_kernel(x_ref, w_ref, b_ref, o_ref, *, K, Wp, rows_out):
    """One grid step = one (n, z, h-tile) output block.

    x_ref: (1, rows_in, K*Cin)  bf16  -- kz-folded channels, (h, w)-flattened rows
    w_ref: (K*K, K*Cin, Coutp)  bf16  -- (ky,kx) major, (kz, c) contraction
    b_ref: (1, Coutp)           f32
    o_ref: (1, rows_out, Coutp) f32
    """
    acc = jnp.zeros(o_ref.shape[1:], jnp.float32)
    # Pure chain of dot-accumulates: no masks / elementwise work between taps.
    for ky in range(K):
        for kx in range(K):
            off = ky * Wp + kx                          # static flat row shift
            patch = x_ref[0, off:off + rows_out, :]     # (rows_out, K*Cin) bf16
            acc = acc + jnp.dot(patch, w_ref[ky * K + kx],
                                preferred_element_type=jnp.float32)
    o_ref[0] = acc + b_ref[...]                         # conv bias, f32 store


def _pick_tile_h(H, Wp, KCin, Coutp, pad, budget_bytes=8 * 1024 * 1024):
    """Largest divisor of H whose double-buffered in+out blocks fit the VMEM budget."""
    best = 1
    for tH in range(1, H + 1):
        if H % tH:
            continue
        rows_in = (tH + 2 * pad) * Wp + 2 * pad
        rows_out = tH * Wp
        per_block = 2 * rows_in * KCin * 2 + 2 * rows_out * Coutp * 4
        if per_block <= budget_bytes:
            best = tH
    return best


def single_conv3d_block_forward(x_ncdhw, weight, bias):
    N, Cin, D, H, W = x_ncdhw.shape
    Cout, Cin_w, K, Kh, Kw = weight.shape
    assert Cin == Cin_w and K == Kh == Kw and K % 2 == 1, (x_ncdhw.shape, weight.shape)
    pad = (K - 1) // 2
    Wp = W + 2 * pad
    KCin = K * Cin

    # Lane-dense output channels when padding is cheap (Cout >= 64); keep tiny Cout
    # narrow so output HBM traffic does not blow up 16-32x.
    if Cout >= 64:
        Coutp = -(-Cout // 128) * 128
    else:
        Coutp = max(8, -(-Cout // 8) * 8)

    tH = _pick_tile_h(H, Wp, KCin, Coutp, pad)
    nT = H // tH
    rows_in = (tH + 2 * pad) * Wp + 2 * pad    # +2*pad slack rows for the flat (ky,kx) shifts
    rows_out = tH * Wp                         # includes 2*pad garbage columns, dropped below

    # ---- wrapper glue (pure layout work done by XLA) ----
    # NCDHW -> NDHWC, zero "same"-padding on all three spatial dims.
    x = jnp.transpose(x_ncdhw, (0, 2, 3, 4, 1))
    xp = jnp.pad(x, ((0, 0), (pad, pad), (pad, pad), (pad, pad), (0, 0)))
    # Fold the K depth taps into the channel dim: (N, D, Hp, Wp, K*Cin).
    xz = jnp.concatenate([xp[:, kz:kz + D] for kz in range(K)], axis=-1)
    # Materialize halo'd H row tiles: (N, D, nT, tH+2p, Wp, K*Cin).
    xt = jnp.concatenate(
        [xz[:, :, t * tH:t * tH + tH + 2 * pad][:, :, None] for t in range(nT)], axis=2)
    xs = xt.reshape(N * D * nT, (tH + 2 * pad) * Wp, KCin)
    xs = jnp.pad(xs, ((0, 0), (0, 2 * pad), (0, 0))).astype(jnp.bfloat16)

    # (Cout, Cin, Kz, Ky, Kx) -> (Ky*Kx, Kz*Cin, Coutp)
    w2 = jnp.transpose(weight, (3, 4, 2, 1, 0)).reshape(K * K, KCin, Cout)
    w2 = jnp.pad(w2, ((0, 0), (0, 0), (0, Coutp - Cout))).astype(jnp.bfloat16)
    b2 = jnp.pad(bias, (0, Coutp - Cout)).reshape(1, Coutp).astype(jnp.float32)

    kernel = functools.partial(_conv3d_tile_kernel, K=K, Wp=Wp, rows_out=rows_out)

    G = N * D * nT
    flops = 2 * G * rows_out * (K * K) * KCin * Coutp
    bytes_accessed = (G * rows_in * KCin * 2                  # bf16 input tiles
                      + K * K * KCin * Coutp * 2 + Coutp * 4  # weights + bias (resident)
                      + G * rows_out * Coutp * 4)             # f32 output, written once
    cost = pl.CostEstimate(flops=flops, transcendentals=0, bytes_accessed=bytes_accessed)

    out_flat = pl.pallas_call(
        kernel,
        out_shape=jax.ShapeDtypeStruct((G, rows_out, Coutp), jnp.float32),
        grid_spec=pltpu.PrefetchScalarGridSpec(
            num_scalar_prefetch=0,
            grid=(G,),
            in_specs=[
                pl.BlockSpec((1, rows_in, KCin), lambda i: (i, 0, 0)),
                pl.BlockSpec((K * K, KCin, Coutp), lambda i: (0, 0, 0)),
                pl.BlockSpec((1, Coutp), lambda i: (0, 0)),
            ],
            out_specs=pl.BlockSpec((1, rows_out, Coutp), lambda i: (i, 0, 0)),
        ),
        compiler_params=pltpu.CompilerParams(
            dimension_semantics=("parallel",),
            # Blocks are capped at ~8 MiB by _pick_tile_h, so 48 MiB is generous on
            # v5e/v6e (128 MiB physical) and still safe on v7x (64 MiB physical).
            vmem_limit_bytes=48 * 1024 * 1024,
        ),
        cost_estimate=cost,
    )(xs, w2, b2)

    out = out_flat.reshape(N, D, nT, tH, Wp, Coutp)[:, :, :, :, :W, :Cout]
    out = out.reshape(N, D, H, W, Cout)
    return jnp.transpose(out, (0, 4, 1, 2, 3))                # back to NCDHW


def _reference(x_ncdhw, weight, bias):
    pad = (weight.shape[2] - 1) // 2
    conv = lax.conv_general_dilated(
        x_ncdhw.astype(jnp.float32), weight.astype(jnp.float32),
        window_strides=(1, 1, 1), padding=[(pad, pad)] * 3,
        dimension_numbers=("NCDHW", "OIDHW", "NCDHW"),
    )
    return conv + bias.reshape(1, -1, 1, 1, 1)


if __name__ == "__main__":
    key = jax.random.PRNGKey(0)
    k_x, k_w, k_b = jax.random.split(key, 3)

    N, Cin, Cout, K = 2, 4, 8, 3
    D = H = W = 8

    x = jax.random.normal(k_x, (N, Cin, D, H, W), dtype=jnp.float32)
    weight = 0.1 * jax.random.normal(k_w, (Cout, Cin, K, K, K), dtype=jnp.float32)
    bias = 0.1 * jax.random.normal(k_b, (Cout,), dtype=jnp.float32)

    fwd = jax.jit(single_conv3d_block_forward)
    out = jax.block_until_ready(fwd(x, weight, bias))

    ref = _reference(x, weight, bias)
    assert out.shape == (N, Cout, D, H, W), out.shape
    # bf16 MXU operands, f32 accumulation -> loose-ish elementwise tolerance.
    assert jnp.allclose(out, ref, atol=2e-2, rtol=2e-2), float(jnp.max(jnp.abs(out - ref)))

    print("KERNEL_OK")
</pallas_src>

<mosaic_0001>
module attributes {stable_mosaic.version = 11 : i64} {
  func.func @_conv3d_tile_kernel(%arg0: i32, %arg1: memref<1x102x12xbf16, #tpu.memory_space<vmem>>, %arg2: memref<9x12x8xbf16, #tpu.memory_space<vmem>>, %arg3: memref<1x8xf32, #tpu.memory_space<vmem>>, %arg4: memref<1x80x8xf32, #tpu.memory_space<vmem>>) attributes {dimension_semantics = [#tpu.dimension_semantics<parallel>], iteration_bounds = array<i64: 16>, scalar_prefetch = 0 : i64, scratch_operands = 0 : i64, tpu.core_type = #tpu.core_type<tc>, window_params = [{transform_indices = @transform_0, window_bounds = array<i64: 1, 102, 12>}, {pipeline_mode = #tpu.pipeline_mode<synchronous>, transform_indices = @transform_1, window_bounds = array<i64: 9, 12, 8>}, {pipeline_mode = #tpu.pipeline_mode<synchronous>, transform_indices = @transform_2, window_bounds = array<i64: 1, 8>}, {transform_indices = @transform_3, window_bounds = array<i64: 1, 80, 8>}]} {
    %cst = arith.constant 0.000000e+00 : f32
    %0 = vector.broadcast %cst : f32 to vector<80x8xf32>
    %c0 = arith.constant 0 : index
    %c0_0 = arith.constant 0 : index
    %c0_1 = arith.constant 0 : index
    %1 = vector.load %arg1[%c0, %c0_0, %c0_1] : memref<1x102x12xbf16, #tpu.memory_space<vmem>>, vector<1x80x12xbf16>
    %2 = vector.shape_cast %1 : vector<1x80x12xbf16> to vector<80x12xbf16>
    %c0_2 = arith.constant 0 : index
    %c0_3 = arith.constant 0 : index
    %c0_4 = arith.constant 0 : index
    %3 = vector.load %arg2[%c0_2, %c0_3, %c0_4] : memref<9x12x8xbf16, #tpu.memory_space<vmem>>, vector<1x12x8xbf16>
    %4 = vector.shape_cast %3 : vector<1x12x8xbf16> to vector<12x8xbf16>
    %cst_5 = arith.constant dense<0.000000e+00> : vector<80x8xf32>
    %5 = tpu.matmul %2, %4, %cst_5 {dimension_numbers = #tpu.dot_dimension_numbers<[1], [0], [0], [1], [0, 0, 1, 1], [], []>} : vector<80x12xbf16>, vector<12x8xbf16>, vector<80x8xf32> -> vector<80x8xf32>
    %6 = arith.addf %0, %5 : vector<80x8xf32>
    %c0_6 = arith.constant 0 : index
    %c1 = arith.constant 1 : index
    %c0_7 = arith.constant 0 : index
    %7 = vector.load %arg1[%c0_6, %c1, %c0_7] : memref<1x102x12xbf16, #tpu.memory_space<vmem>>, vector<1x80x12xbf16>
    %8 = vector.shape_cast %7 : vector<1x80x12xbf16> to vector<80x12xbf16>
    %c1_8 = arith.constant 1 : index
    %c0_9 = arith.constant 0 : index
    %c0_10 = arith.constant 0 : index
    %9 = vector.load %arg2[%c1_8, %c0_9, %c0_10] : memref<9x12x8xbf16, #tpu.memory_space<vmem>>, vector<1x12x8xbf16>
    %10 = vector.shape_cast %9 : vector<1x12x8xbf16> to vector<12x8xbf16>
    %cst_11 = arith.constant dense<0.000000e+00> : vector<80x8xf32>
    %11 = tpu.matmul %8, %10, %cst_11 {dimension_numbers = #tpu.dot_dimension_numbers<[1], [0], [0], [1], [0, 0, 1, 1], [], []>} : vector<80x12xbf16>, vector<12x8xbf16>, vector<80x8xf32> -> vector<80x8xf32>
    %12 = arith.addf %6, %11 : vector<80x8xf32>
    %c0_12 = arith.constant 0 : index
    %c2 = arith.constant 2 : index
    %c0_13 = arith.constant 0 : index
    %13 = vector.load %arg1[%c0_12, %c2, %c0_13] : memref<1x102x12xbf16, #tpu.memory_space<vmem>>, vector<1x80x12xbf16>
    %14 = vector.shape_cast %13 : vector<1x80x12xbf16> to vector<80x12xbf16>
    %c2_14 = arith.constant 2 : index
    %c0_15 = arith.constant 0 : index
    %c0_16 = arith.constant 0 : index
    %15 = vector.load %arg2[%c2_14, %c0_15, %c0_16] : memref<9x12x8xbf16, #tpu.memory_space<vmem>>, vector<1x12x8xbf16>
    %16 = vector.shape_cast %15 : vector<1x12x8xbf16> to vector<12x8xbf16>
    %cst_17 = arith.constant dense<0.000000e+00> : vector<80x8xf32>
    %17 = tpu.matmul %14, %16, %cst_17 {dimension_numbers = #tpu.dot_dimension_numbers<[1], [0], [0], [1], [0, 0, 1, 1], [], []>} : vector<80x12xbf16>, vector<12x8xbf16>, vector<80x8xf32> -> vector<80x8xf32>
    %18 = arith.addf %12, %17 : vector<80x8xf32>
    %c0_18 = arith.constant 0 : index
    %c10 = arith.constant 10 : index
    %c0_19 = arith.constant 0 : index
    %19 = vector.load %arg1[%c0_18, %c10, %c0_19] : memref<1x102x12xbf16, #tpu.memory_space<vmem>>, vector<1x80x12xbf16>
    %20 = vector.shape_cast %19 : vector<1x80x12xbf16> to vector<80x12xbf16>
    %c3 = arith.constant 3 : index
    %c0_20 = arith.constant 0 : index
    %c0_21 = arith.constant 0 : index
    %21 = vector.load %arg2[%c3, %c0_20, %c0_21] : memref<9x12x8xbf16, #tpu.memory_space<vmem>>, vector<1x12x8xbf16>
    %22 = vector.shape_cast %21 : vector<1x12x8xbf16> to vector<12x8xbf16>
    %cst_22 = arith.constant dense<0.000000e+00> : vector<80x8xf32>
    %23 = tpu.matmul %20, %22, %cst_22 {dimension_numbers = #tpu.dot_dimension_numbers<[1], [0], [0], [1], [0, 0, 1, 1], [], []>} : vector<80x12xbf16>, vector<12x8xbf16>, vector<80x8xf32> -> vector<80x8xf32>
    %24 = arith.addf %18, %23 : vector<80x8xf32>
    %c0_23 = arith.constant 0 : index
    %c11 = arith.constant 11 : index
    %c0_24 = arith.constant 0 : index
    %25 = vector.load %arg1[%c0_23, %c11, %c0_24] : memref<1x102x12xbf16, #tpu.memory_space<vmem>>, vector<1x80x12xbf16>
    %26 = vector.shape_cast %25 : vector<1x80x12xbf16> to vector<80x12xbf16>
    %c4 = arith.constant 4 : index
    %c0_25 = arith.constant 0 : index
    %c0_26 = arith.constant 0 : index
    %27 = vector.load %arg2[%c4, %c0_25, %c0_26] : memref<9x12x8xbf16, #tpu.memory_space<vmem>>, vector<1x12x8xbf16>
    %28 = vector.shape_cast %27 : vector<1x12x8xbf16> to vector<12x8xbf16>
    %cst_27 = arith.constant dense<0.000000e+00> : vector<80x8xf32>
    %29 = tpu.matmul %26, %28, %cst_27 {dimension_numbers = #tpu.dot_dimension_numbers<[1], [0], [0], [1], [0, 0, 1, 1], [], []>} : vector<80x12xbf16>, vector<12x8xbf16>, vector<80x8xf32> -> vector<80x8xf32>
    %30 = arith.addf %24, %29 : vector<80x8xf32>
    %c0_28 = arith.constant 0 : index
    %c12 = arith.constant 12 : index
    %c0_29 = arith.constant 0 : index
    %31 = vector.load %arg1[%c0_28, %c12, %c0_29] : memref<1x102x12xbf16, #tpu.memory_space<vmem>>, vector<1x80x12xbf16>
    %32 = vector.shape_cast %31 : vector<1x80x12xbf16> to vector<80x12xbf16>
    %c5 = arith.constant 5 : index
    %c0_30 = arith.constant 0 : index
    %c0_31 = arith.constant 0 : index
    %33 = vector.load %arg2[%c5, %c0_30, %c0_31] : memref<9x12x8xbf16, #tpu.memory_space<vmem>>, vector<1x12x8xbf16>
    %34 = vector.shape_cast %33 : vector<1x12x8xbf16> to vector<12x8xbf16>
    %cst_32 = arith.constant dense<0.000000e+00> : vector<80x8xf32>
    %35 = tpu.matmul %32, %34, %cst_32 {dimension_numbers = #tpu.dot_dimension_numbers<[1], [0], [0], [1], [0, 0, 1, 1], [], []>} : vector<80x12xbf16>, vector<12x8xbf16>, vector<80x8xf32> -> vector<80x8xf32>
    %36 = arith.addf %30, %35 : vector<80x8xf32>
    %c0_33 = arith.constant 0 : index
    %c20 = arith.constant 20 : index
    %c0_34 = arith.constant 0 : index
    %37 = vector.load %arg1[%c0_33, %c20, %c0_34] : memref<1x102x12xbf16, #tpu.memory_space<vmem>>, vector<1x80x12xbf16>
    %38 = vector.shape_cast %37 : vector<1x80x12xbf16> to vector<80x12xbf16>
    %c6 = arith.constant 6 : index
    %c0_35 = arith.constant 0 : index
    %c0_36 = arith.constant 0 : index
    %39 = vector.load %arg2[%c6, %c0_35, %c0_36] : memref<9x12x8xbf16, #tpu.memory_space<vmem>>, vector<1x12x8xbf16>
    %40 = vector.shape_cast %39 : vector<1x12x8xbf16> to vector<12x8xbf16>
    %cst_37 = arith.constant dense<0.000000e+00> : vector<80x8xf32>
    %41 = tpu.matmul %38, %40, %cst_37 {dimension_numbers = #tpu.dot_dimension_numbers<[1], [0], [0], [1], [0, 0, 1, 1], [], []>} : vector<80x12xbf16>, vector<12x8xbf16>, vector<80x8xf32> -> vector<80x8xf32>
    %42 = arith.addf %36, %41 : vector<80x8xf32>
    %c0_38 = arith.constant 0 : index
    %c21 = arith.constant 21 : index
    %c0_39 = arith.constant 0 : index
    %43 = vector.load %arg1[%c0_38, %c21, %c0_39] : memref<1x102x12xbf16, #tpu.memory_space<vmem>>, vector<1x80x12xbf16>
    %44 = vector.shape_cast %43 : vector<1x80x12xbf16> to vector<80x12xbf16>
    %c7 = arith.constant 7 : index
    %c0_40 = arith.constant 0 : index
    %c0_41 = arith.constant 0 : index
    %45 = vector.load %arg2[%c7, %c0_40, %c0_41] : memref<9x12x8xbf16, #tpu.memory_space<vmem>>, vector<1x12x8xbf16>
    %46 = vector.shape_cast %45 : vector<1x12x8xbf16> to vector<12x8xbf16>
    %cst_42 = arith.constant dense<0.000000e+00> : vector<80x8xf32>
    %47 = tpu.matmul %44, %46, %cst_42 {dimension_numbers = #tpu.dot_dimension_numbers<[1], [0], [0], [1], [0, 0, 1, 1], [], []>} : vector<80x12xbf16>, vector<12x8xbf16>, vector<80x8xf32> -> vector<80x8xf32>
    %48 = arith.addf %42, %47 : vector<80x8xf32>
    %c0_43 = arith.constant 0 : index
    %c22 = arith.constant 22 : index
    %c0_44 = arith.constant 0 : index
    %49 = vector.load %arg1[%c0_43, %c22, %c0_44] : memref<1x102x12xbf16, #tpu.memory_space<vmem>>, vector<1x80x12xbf16>
    %50 = vector.shape_cast %49 : vector<1x80x12xbf16> to vector<80x12xbf16>
    %c8 = arith.constant 8 : index
    %c0_45 = arith.constant 0 : index
    %c0_46 = arith.constant 0 : index
    %51 = vector.load %arg2[%c8, %c0_45, %c0_46] : memref<9x12x8xbf16, #tpu.memory_space<vmem>>, vector<1x12x8xbf16>
    %52 = vector.shape_cast %51 : vector<1x12x8xbf16> to vector<12x8xbf16>
    %cst_47 = arith.constant dense<0.000000e+00> : vector<80x8xf32>
    %53 = tpu.matmul %50, %52, %cst_47 {dimension_numbers = #tpu.dot_dimension_numbers<[1], [0], [0], [1], [0, 0, 1, 1], [], []>} : vector<80x12xbf16>, vector<12x8xbf16>, vector<80x8xf32> -> vector<80x8xf32>
    %54 = arith.addf %48, %53 : vector<80x8xf32>
    %c0_48 = arith.constant 0 : index
    %c0_49 = arith.constant 0 : index
    %55 = vector.load %arg3[%c0_48, %c0_49] : memref<1x8xf32, #tpu.memory_space<vmem>>, vector<1x8xf32>
    %56 = vector.broadcast %55 : vector<1x8xf32> to vector<80x8xf32>
    %57 = arith.addf %54, %56 : vector<80x8xf32>
    %c0_50 = arith.constant 0 : index
    %c0_51 = arith.constant 0 : index
    %c0_52 = arith.constant 0 : index
    %58 = vector.load %arg4[%c0_50, %c0_51, %c0_52] : memref<1x80x8xf32, #tpu.memory_space<vmem>>, vector<1x80x8xf32>
    %59 = vector.shape_cast %58 : vector<1x80x8xf32> to vector<80x8xf32>
    %60 = vector.shape_cast %57 : vector<80x8xf32> to vector<1x80x8xf32>
    tpu.vector_store %arg4[%c0_50, %c0_51, %c0_52], %60 {strides = array<i32>} : memref<1x80x8xf32, #tpu.memory_space<vmem>>, vector<1x80x8xf32>,
    return
  }
  func.func @transform_0(%arg0: i32) -> (i32, i32, i32) {
    %c0_i32 = arith.constant 0 : i32
    %c0_i32_0 = arith.constant 0 : i32
    %c0_i32_1 = arith.constant 0 : i32
    return %arg0, %c0_i32, %c0_i32_0 : i32, i32, i32
  }
  func.func @transform_1(%arg0: i32) -> (i32, i32, i32) {
    %c0_i32 = arith.constant 0 : i32
    %c0_i32_0 = arith.constant 0 : i32
    %c0_i32_1 = arith.constant 0 : i32
    %c0_i32_2 = arith.constant 0 : i32
    return %c0_i32, %c0_i32_0, %c0_i32_1 : i32, i32, i32
  }
  func.func @transform_2(%arg0: i32) -> (i32, i32) {
    %c0_i32 = arith.constant 0 : i32
    %c0_i32_0 = arith.constant 0 : i32
    %c0_i32_1 = arith.constant 0 : i32
    return %c0_i32, %c0_i32_0 : i32, i32
  }
  func.func @transform_3(%arg0: i32) -> (i32, i32, i32) {
    %c0_i32 = arith.constant 0 : i32
    %c0_i32_0 = arith.constant 0 : i32
    %c0_i32_1 = arith.constant 0 : i32
    return %arg0, %c0_i32, %c0_i32_0 : i32, i32, i32
  }
}

</mosaic_0001>

<bundles_post_ra>
// kernel: single_conv3d_block_forward.1
= control target key start
LH: loop header
LB: loop body
LE: loop exit
PB: predicated region body
PF: predicated region fallthrough
CT: control target
= control target key end

     0   :  { %s1991_s12 = smov 0   ;;  %s2450_s0 = inlined_call_operand.vmem [shape: bf16[16,102,12], index: 0, kind: input, shape index: {}]   ;;  %s2451_s1 = inlined_call_operand.vmem [shape: bf16[9,12,8], index: 1, kind: input, shape index: {}]   ;;  %s2452_s2 = inlined_call_operand.vmem [shape: f32[1,8], index: 2, kind: input, shape index: {}]   ;;  %s2453_s3 = inlined_call_operand.vmem [shape: f32[16,80,8], index: 3, kind: output, shape index: {}]  }
   0x1 LB: > { %s1560_s13 = sadd.s32 4294967295, %s1967_s12   ;;  %p1564_p0 = scmp.ge.s32.totalorder %s1967_s12, 1  ;;  %s1967_s12 = sphi %s1991_s12, %s13_s12  }
   0x2   : > { %p137_p1 = scmp.lt.s32.totalorder %s1967_s12, 17 }
   0x4   : > { %p138_p2 = pnand %p1564_p0, %p137_p1 }
   0x5   : > { %vm282_vm0 = vcmask (!%p138_p2), 1045504   ;;  %v1969_v0 = vmov (!%p138_p2), 0.0   ;;  %v1929_v1 = vld [vmem:[%s2451_s1 + $0x8] sm:$0x3f] (!%p138_p2)   ;;  %p161_p3 = scmp.lt.s32.totalorder (!%p138_p2), %s1560_s13, 15  ;;  %vm1970_vm1 = vmmov (!%p138_p2), 0  }
   0x6   : > { %141 = sbr.rel (%p138_p2) target bundleno = 422 (0x1a6), region = 32  ;;  %1717 = vmatprep.subr.bf16.mxu0 (!%p138_p2), %v1969_v0  ;;  %1915 = vmatprep.subr.bf16.mxu1 (!%p138_p2), %v1969_v0  ;;  %v284_v2 = vsel (!%p138_p2), %vm282_vm0, %v1929_v1, 0  ;;  %vm216_vm2 = vsmask.f32 (!%p138_p2), 7424  ;;  %vm266_vm3 = vcmask (!%p138_p2), 97280   ;;  %vm457_vm4 = vcmask (!%p138_p2), 1046528  }
   0x7   : > { %1719 = vmatprep.mubr.msk.bf16.mxu0 (!%p138_p2), %vm1970_vm1, %v1969_v0  ;;  %1731 = vmatprep.mubr.msk.bf16.mxu1 (!%p138_p2), %vm1970_vm1, %v1969_v0  ;;  %v1934_v13 = vld [vmem:[%s2451_s1 + $0x10] sm:$0x3f] (!%p138_p2)   ;;  %v1935_v19 = vld [vmem:[%s2451_s1] sm:$0x3f] (!%p138_p2)   ;;  %v1938_v46 = vld [vmem:[%s2451_s1 + $0x18] sm:$0x3f] (!%p138_p2)  }
   0x8   : > { %1718 = vmatpush3.bf16.msra.mxu0 (!%p138_p2), %v284_v2  ;;  %1916 = vmatpush3.bf16.msra.mxu1 (!%p138_p2), %v284_v2  ;;  %v490_v26 = vsel (!%p138_p2), %vm282_vm0, %v1934_v13, 0  ;;  %v375_v31 = vsel (!%p138_p2), %vm282_vm0, %v1935_v19, 0  ;;  %v649_v60 = vsel (!%p138_p2), %vm282_vm0, %v1938_v46, 0  ;;  %v1940_v1 = vld [vmem:[%s2451_s1 + $0x20] sm:$0x3f] (!%p138_p2)   ;;  %vm1359_vm7 = vcmask (!%p138_p2), 1044480  }
   0x9   : > { %1761 = vmatprep.subr.bf16.mxu0 (!%p138_p2), %v1969_v0  ;;  %1739 = vmatprep.subr.bf16.mxu1 (!%p138_p2), %v1969_v0  ;;  %vm741_vm5 = vsmask.f32 (!%p138_p2), 6400  ;;  %vm1192_vm6 = vsmask.f32 (!%p138_p2), 5376  ;;  %vm1494_vm8 = vcmask (!%p138_p2), 64512  }
   0xd   : > { %s2455_s13 = smov (!%p161_p3, %s1560_s13), 15 }
   0xe   : > { %s1917_s16 = smul.u32 52, %s2455_s13 }
   0xf   : > { %s1918_s9 = smul.u32 80, %s2455_s13 }
  0x10   : > { %s2017_s19 = scalar_lea.vmem %s2450_s0, %s1917_s16 }
  0x11   : > { %v172_v3 = vld [vmem:[%s2017_s19] sm:$0xf]  ;;  %v2021_v4 = vld [vmem:[%s2017_s19 + $0x4] sm:$0xf]  ;;  %v2027_v6 = vld [vmem:[%s2017_s19 + $0x8] sm:$0xff]   ;;  %s2411_s16 = scalar_lea.vmem %s2453_s3, %s1918_s9 }
  0x12   : > { %v2024_v5 = vcombine.low %v172_v3, %v2021_v4  ;;  %v225_v9 = vshll.u32 %v2027_v6, 16  ;;  %v2033_v10 = vld [vmem:[%s2017_s19 + $0x18] sm:$0xff]   ;;  %v2036_v11 = vld [vmem:[%s2017_s19 + $0x20] sm:$0xff]   ;;  %v2039_v12 = vld [vmem:[%s2017_s19 + $0x10] sm:$0xff]   ;;  %v229_v23 = vshrl.u32 %v2027_v6, 16  ;;  %v459_v61 = vrot.slane %v2027_v6, 1 }
  0x13   : > { %v241_v16 = vshll.u32 %v2033_v10, 16  ;;  %v245_v17 = vshrl.u32 %v2033_v10, 16  ;;  %v249_v18 = vshll.u32 %v2036_v11, 16  ;;  %v2051_v20 = vld [vmem:[%s2017_s19 + $0x28] ss:$0 sps:$4 sm:$0x11]  }
  0x14   : > { %v218_v7 = vshrl.u32 %v2024_v5, 16  ;;  %v220_v8 = vshll.u32 %v2024_v5, 16  ;;  %v227_v15 = vrot.slane %v225_v9, 1  ;;  %v233_v24 = vshll.u32 %v2039_v12, 16  ;;  %v2072_v39 = vld [vmem:[%s2017_s19 + $0x24] sm:$0xff]   ;;  %v2089_v48 = vld [vmem:[%s2017_s19 + $0xc] sm:$0xff]  }
  0x15   : > { %v243_v22 = vrot.slane %v241_v16, 1  ;;  %v251_v25 = vrot.slane %v249_v18, 1  ;;  %v253_v29 = vshrl.u32 %v2036_v11, 16  ;;  %v257_v30 = vshll.u32 %v2051_v20, 16  ;;  %v450_v43 = vld [vmem:[%s2017_s19] sm:$0xe] }
  0x16   : > { %v222_v14 = vrot.slane %v220_v8, 1  ;;  %v231_v33 = vor.u32 %v229_v23, %v227_v15  ;;  %v235_v34 = vrot.slane %v233_v24, 1  ;;  %v237_v38 = vshrl.u32 %v2039_v12, 16  ;;  %v1948_v41 = vld [vmem:[%s2017_s19 + $0x2c] ss:$0 sps:$4 sm:$0x11]  }
  0x17   : > { %v247_v28 = vor.u32 %v245_v17, %v243_v22  ;;  %v255_v35 = vor.u32 %v253_v29, %v251_v25  ;;  %v259_v36 = vrot.slane %v257_v30, 1  ;;  %v624_v44 = vrot.slane %v2072_v39, 1  ;;  %v901_v47 = vld [vmem:[%s2017_s19 + $0x4] sm:$0xc]  ;;  %v2099_v52 = vld [vmem:[%s2017_s19 + $0x8] sm:$0xf] }
  0x18   : > { %v223_v21 = vor.u32 %v222_v14, %v218_v7  ;;  %v236_v37 = vsel %vm216_vm2, %v231_v33, %v235_v34  ;;  %v239_v42 = vor.u32 %v237_v38, %v235_v34  ;;  %v626_v45 = vrot.slane %v1948_v41, 1  ;;  %v2102_v53 = vld [vmem:[%s2017_s19 + $0x14] sm:$0xff]   ;;  %v2108_v55 = vld [vmem:[%s2017_s19 + $0x1c] sm:$0xff]   ;;  %v1026_v58 = vld [vmem:[%s2017_s19 + $0x8] sm:$0xc] }
  0x19   : > { %v252_v32 = vsel %vm216_vm2, %v247_v28, %v251_v25  ;;  %v260_v40 = vsel %vm216_vm2, %v255_v35, %v259_v36  ;;  %v1589_v51 = vcombine.low %v450_v43, %v2021_v4  ;;  %v2105_v54 = vld [vmem:[%s2017_s19 + $0x10] sm:$0xff]   ;;  %v1621_v56 = vcombine.low %v901_v47, %v2099_v52  ;;  %v2114_v59 = vld [vmem:[%s2017_s19 + $0xc] sm:$0xf]  ;;  %v2119_v62 = vld [vmem:[%s2017_s19 + $0x18] sm:$0xff]  }
  0x1a   : > { %v228_v27 = vsel %vm216_vm2, %v223_v21, %v227_v15  ;;  %1732 = vmatmul.mubr.msk.bf16.vlgmr.msra.gmra.mrb[0].mxu1 %vm266_vm3, %v252_v32  ;;  %v2094_v49 = vsel %vm457_vm4, %v624_v44, %v626_v45  ;;  %v244_v50 = vsel %vm216_vm2, %v239_v42, %v243_v22  ;;  %v910_v57 = vrot.slane %v2089_v48, 2  ;;  %v2122_v63 = vld [vmem:[%s2017_s19 + $0x20] sm:$0xff]   ;;  %v2129_v2 = vld [vmem:[%s2017_s19 + $0x2c] ss:$0 sps:$4 sm:$0x33]  }
  0x1b   : > { %1720 = vmatmul.mubr.msk.bf16.vlgmr.msra.gmra.mrb[0].mxu0 %vm266_vm3, %v228_v27  ;;  %1740 = vmatpush3.bf16.msra.mxu1 %v375_v31  ;;  %v909_v3 = vrot.slane %v1621_v56, 2  ;;  %v912_v4 = vrot.slane %v2102_v53, 2  ;;  %v2133_v7 = vcombine.low %v1026_v58, %v2114_v59  ;;  %v458_v8 = vrot.slane %v1589_v51, 1  ;;  %v2140_v14 = vld [vmem:[%s2017_s19 + $0x28] sm:$0xff]  }
  0x1c   : > { %1762 = vmatpush3.bf16.msra.mxu0 %v490_v26  ;;  %1723 = vmatprep.mubr.msk.bf16.mxu0 %vm1970_vm1, %v1969_v0  ;;  %v1069_v9 = vrot.slane %v2105_v54, 2  ;;  %v914_v13 = vrot.slane %v2108_v55, 2  ;;  %v1071_v19 = vrot.slane %v2119_v62, 2  ;;  %v916_v21 = vrot.slane %v2072_v39, 2  ;;  %v1943_v51 = vld [vmem:[%s2451_s1 + $0x28] sm:$0x3f]  }
  0x1d   : > { %1805 = vmatprep.subr.bf16.mxu0 %v1969_v0  ;;  %1735 = vmatprep.mubr.msk.bf16.mxu1 %vm1970_vm1, %v1969_v0  ;;  %v2145_v15 = vsel %vm282_vm0, %v909_v3, %v910_v57  ;;  %v2148_v16 = vsel %vm282_vm0, %v910_v57, %v912_v4  ;;  %v1068_v17 = vrot.slane %v2133_v7, 2  ;;  %v1073_v22 = vrot.slane %v2122_v63, 2  ;;  %v1958_v31 = vld [vmem:[%s2017_s19 + $0x30] ss:$0 sps:$4 sm:$0x33]  }
  0x1e   : > { %1783 = vmatprep.subr.bf16.mxu1 %v1969_v0  ;;  %v2154_v18 = vsel %vm282_vm0, %v912_v4, %v914_v13  ;;  %v918_v23 = vrot.slane %v2129_v2, 2  ;;  %v460_v24 = vsel %vm457_vm4, %v458_v8, %v459_v61  ;;  %v2166_v25 = vsel %vm282_vm0, %v1069_v9, %v1071_v19  ;;  %v1945_v4 = vld [vmem:[%s2451_s1 + $0x30] sm:$0x3f]  }
  0x1f   : > { %v1075_v26 = vrot.slane %v2140_v14, 2  ;;  %v816_v27 = vsel %vm282_vm0, %v1940_v1, 0  ;;  %v2171_v28 = vsel %vm282_vm0, %v914_v13, %v916_v21  ;;  %v2174_v29 = vsel %vm282_vm0, %v1071_v19, %v1073_v22 }
  0x20   : > { %v2177_v30 = vsel %vm282_vm0, %v916_v21, %v918_v23  ;;  %v1077_v33 = vrot.slane %v1958_v31, 2  ;;  %v461_v34 = vrot.slane %v2039_v12, 1  ;;  %v465_v38 = vrot.slane %v2036_v11, 1 }
  0x21   : > { %v2181_v32 = vsel %vm282_vm0, %v1073_v22, %v1075_v26  ;;  %v467_v42 = vrot.slane %v2051_v20, 1  ;;  %v751_v46 = vshrl.u32 %v2089_v48, 16  ;;  %v760_v1 = vshrl.u32 %v2102_v53, 16 }
  0x22   : > { %1736 = vmatmul.mubr.msk.bf16.gmra.mrb[4].mxu1 %vm266_vm3, %v260_v40  ;;  %v2191_v35 = vsel %vm282_vm0, %v1075_v26, %v1077_v33  ;;  %v462_v36 = vsel %vm457_vm4, %v459_v61, %v461_v34  ;;  %v575_v40 = vld [vmem:[%s2017_s19 + $0x4] sm:$0xe]  ;;  %v763_v3 = vshll.u32 %v2102_v53, 16  ;;  %v620_v8 = vrot.slane %v2102_v53, 1 }
  0x23   : > { %1724 = vmatmul.mubr.msk.bf16.gmra.mrb[4].mxu0 %vm266_vm3, %v236_v37  ;;  %1741 = vmatprep.mubr.msk.bf16.mxu1 %vm1970_vm1, %v1969_v0  ;;  %v463_v37 = vrot.slane %v2033_v10, 1  ;;  %v1598_v41 = vcombine.low %v575_v40, %v2099_v52  ;;  %v468_v20 = vsel %vm457_vm4, %v465_v38, %v467_v42  ;;  %v753_v57 = vrot.slane %v751_v46, 1 }
  0x24   : > { %1727 = vmatprep.mubr.msk.bf16.mxu0 %vm1970_vm1, %v1969_v0  ;;  %v762_v13 = vrot.slane %v760_v1, 1  ;;  %v1100_v19 = vsel %vm282_vm0, %v1945_v4, 0  ;;  %v769_v23 = vshrl.u32 %v2108_v55, 16  ;;  %v772_v53 = vshll.u32 %v2108_v55, 16 }
  0x25   : > { %v743_v43 = vshrl.u32 %v1598_v41, 16  ;;  %v746_v45 = vshll.u32 %v1598_v41, 16  ;;  %v617_v47 = vrot.slane %v1598_v41, 1  ;;  %v787_v41 = vshrl.u32 %v2129_v2, 16 }
  0x26   : > { %v774_v31 = vrot.slane %v772_v53, 2  ;;  %v790_v42 = vshll.u32 %v2129_v2, 16  ;;  %v1951_v2 = vld [vmem:[%s2451_s1 + $0x38] sm:$0x3f]  }
  0x27   : > { %v745_v52 = vrot.slane %v743_v43, 1  ;;  %v748_v56 = vrot.slane %v746_v45, 2 }
  0x28   : > { %v792_v45 = vrot.slane %v790_v42, 2 }
  0x2a   : > { %1742 = vmatmul.mubr.msk.bf16.vlgmr.msra.gmra.mrb[8].mxu1 %vm266_vm3, %v2024_v5  ;;  %v2159_v5 = vsel %vm282_vm0, %v1068_v17, %v1069_v9  ;;  %v765_v17 = vrot.slane %v763_v3, 2 }
  0x2b   : > { %1728 = vmatmul.mubr.msk.bf16.gmra.mrb[8].mxu0 %vm266_vm3, %v244_v50  ;;  %1784 = vmatpush3.bf16.msra.mxu1 %v649_v60  ;;  %v618_v50 = vrot.slane %v2089_v48, 1 }
  0x2c   : > { %1763 = vmatprep.mubr.msk.bf16.mxu0 %vm1970_vm1, %v1969_v0  ;;  %1745 = vmatprep.mubr.msk.bf16.mxu1 %vm1970_vm1, %v1969_v0  ;;  %v766_v22 = vor.u32 %v765_v17, %v762_v13  ;;  %v1232_v13 = vshll.u32 %v2140_v14, 16 }
  0x2d   : > { %1827 = vmatprep.subr.bf16.mxu1 %v1969_v0  ;;  %v619_v60 = vsel %vm457_vm4, %v617_v47, %v618_v50  ;;  %v621_v21 = vsel %vm457_vm4, %v618_v50, %v620_v8 }
  0x32   : > { %1746 = vmatmul.mubr.msk.bf16.gmra.mrb[12].mxu1 %vm266_vm3, %v2027_v6  ;;  %v464_v6 = vsel %vm457_vm4, %v461_v34, %v463_v37 }
  0x33   : > { %1764 = vmatmul.mubr.msk.bf16.vlgmr.msra.gmra.mrb[12].mxu0 %vm266_vm3, %v460_v24  ;;  %1749 = vmatprep.mubr.msk.bf16.mxu1 %vm1970_vm1, %v1969_v0  ;;  %v622_v24 = vrot.slane %v2108_v55, 1 }
  0x34   : > { %1806 = vmatpush3.bf16.msra.mxu0 %v816_v27  ;;  %1767 = vmatprep.mubr.msk.bf16.mxu0 %vm1970_vm1, %v1969_v0  ;;  %v771_v27 = vrot.slane %v769_v23, 1  ;;  %v1960_v23 = vld [vmem:[%s2017_s19 + $0x30] ss:$0 sps:$4 sm:$0x77]  }
  0x35   : > { %1849 = vmatprep.subr.bf16.mxu0 %v1969_v0  ;;  %v623_v33 = vsel %vm457_vm4, %v620_v8, %v622_v24  ;;  %v625_v40 = vsel %vm457_vm4, %v622_v24, %v624_v44  ;;  %v1238_v24 = vshrl.u32 %v1960_v23, 16 }
  0x36   : > { %v775_v34 = vor.u32 %v774_v31, %v771_v27 }
  0x38   : > { %v776_v55 = vsel %vm741_vm5, %v766_v22, %v775_v34 }
  0x3a   : > { %1750 = vmatmul.mubr.msk.bf16.gmra.mrb[16].mxu1 %vm266_vm3, %v2039_v12  ;;  %v466_v12 = vsel %vm457_vm4, %v463_v37, %v465_v38  ;;  %v781_v37 = vshll.u32 %v2072_v39, 16 }
  0x3b   : > { %1768 = vmatmul.mubr.msk.bf16.gmra.mrb[16].mxu0 %vm266_vm3, %v462_v36  ;;  %1753 = vmatprep.mubr.msk.bf16.mxu1 %vm1970_vm1, %v1969_v0  ;;  %v778_v36 = vshrl.u32 %v2072_v39, 16  ;;  %v789_v39 = vrot.slane %v787_v41, 1 }
  0x3c   : > { %1771 = vmatprep.mubr.msk.bf16.mxu0 %vm1970_vm1, %v1969_v0  ;;  %v783_v38 = vrot.slane %v781_v37, 2 }
  0x3d   : > { %v793_v44 = vor.u32 %v792_v45, %v789_v39 }
  0x42   : > { %1754 = vmatmul.mubr.msk.bf16.gmra.mrb[20].mxu1 %vm266_vm3, %v2033_v10  ;;  %v754_v10 = vshll.u32 %v2089_v48, 16  ;;  %v749_v48 = vor.u32 %v748_v56, %v745_v52  ;;  %v1211_v52 = vshrl.u32 %v2119_v62, 16  ;;  %v1214_v56 = vshll.u32 %v2119_v62, 16 }
  0x43   : > { %1772 = vmatmul.mubr.msk.bf16.gmra.mrb[20].mxu0 %vm266_vm3, %v464_v6  ;;  %1757 = vmatprep.mubr.msk.bf16.mxu1 %vm1970_vm1, %v1969_v0  ;;  %v780_v6 = vrot.slane %v778_v36, 1 }
  0x44   : > { %1775 = vmatprep.mubr.msk.bf16.mxu0 %vm1970_vm1, %v1969_v0  ;;  %v756_v58 = vrot.slane %v754_v10, 2  ;;  %v1267_v10 = vsel %vm282_vm0, %v1951_v2, 0 }
  0x46   : > { %v757_v61 = vor.u32 %v756_v58, %v753_v57  ;;  %v1213_v58 = vrot.slane %v1211_v52, 2 }
  0x48   : > { %v758_v9 = vsel %vm741_vm5, %v749_v48, %v757_v61  ;;  %v767_v26 = vsel %vm741_vm5, %v757_v61, %v766_v22  ;;  %v1220_v48 = vshrl.u32 %v2122_v63, 16  ;;  %v1223_v61 = vshll.u32 %v2122_v63, 16 }
  0x49   : > { %v1234_v22 = vrot.slane %v1232_v13, 3 }
  0x4a   : > { %1758 = vmatmul.mubr.msk.bf16.gmra.mrb[24].mxu1 %vm266_vm3, %v2036_v11  ;;  %v941_v11 = vsel %vm282_vm0, %v1943_v51, 0  ;;  %v1222_v3 = vrot.slane %v1220_v48, 2  ;;  %v1225_v4 = vrot.slane %v1223_v61, 3 }
  0x4b   : > { %1776 = vmatmul.mubr.msk.bf16.gmra.mrb[24].mxu0 %vm266_vm3, %v466_v12  ;;  %1785 = vmatprep.mubr.msk.bf16.mxu1 %vm1970_vm1, %v1969_v0  ;;  %v784_v12 = vor.u32 %v783_v38, %v780_v6  ;;  %v1369_v6 = vrot.slane %v1960_v23, 3 }
  0x4c   : > { %1779 = vmatprep.mubr.msk.bf16.mxu0 %vm1970_vm1, %v1969_v0  ;;  %v1226_v8 = vor.u32 %v1225_v4, %v1222_v3 }
  0x4d   : > { %v785_v43 = vsel %vm741_vm5, %v775_v34, %v784_v12  ;;  %v794_v46 = vsel %vm741_vm5, %v784_v12, %v793_v44 }
  0x52   : > { %1786 = vmatmul.mubr.msk.bf16.vlgmr.msra.gmra.mrb[28].mxu1 %vm266_vm3, %v619_v60  ;;  %v1216_v60 = vrot.slane %v1214_v56, 3 }
  0x53   : > { %1780 = vmatmul.mubr.msk.bf16.gmra.mrb[28].mxu0 %vm266_vm3, %v468_v20  ;;  %1828 = vmatpush3.bf16.msra.mxu1 %v941_v11  ;;  %v1361_v11 = vrot.slane %v2105_v54, 3 }
  0x54   : > { %1807 = vmatprep.mubr.msk.bf16.mxu0 %vm1970_vm1, %v1969_v0  ;;  %1789 = vmatprep.mubr.msk.bf16.mxu1 %vm1970_vm1, %v1969_v0 }
  0x55   : > { %1871 = vmatprep.subr.bf16.mxu1 %v1969_v0 }
  0x5a   : > { %1790 = vmatmul.mubr.msk.bf16.gmra.mrb[32].mxu1 %vm266_vm3, %v621_v21 }
  0x5b   : > { %1808 = vmatmul.mubr.msk.bf16.vlgmr.msra.gmra.mrb[32].mxu0 %vm266_vm3, %v758_v9  ;;  %1793 = vmatprep.mubr.msk.bf16.mxu1 %vm1970_vm1, %v1969_v0  ;;  %v1229_v9 = vshrl.u32 %v2140_v14, 16 }
  0x5c   : > { %1850 = vmatpush3.bf16.msra.mxu0 %v1100_v19  ;;  %1811 = vmatprep.mubr.msk.bf16.mxu0 %vm1970_vm1, %v1969_v0 }
  0x5d   : > { %1893 = vmatprep.subr.bf16.mxu0 %v1969_v0  ;;  %v1231_v21 = vrot.slane %v1229_v9, 2 }
  0x5f   : > { %v1235_v53 = vor.u32 %v1234_v22, %v1231_v21 }
  0x61   : > { %v1236_v31 = vsel %vm1192_vm6, %v1226_v8, %v1235_v53 }
  0x62   : > { %1794 = vmatmul.mubr.msk.bf16.gmra.mrb[36].mxu1 %vm266_vm3, %v623_v33  ;;  %v1240_v33 = vrot.slane %v1238_v24, 2 }
  0x63   : > { %1812 = vmatmul.mubr.msk.bf16.gmra.mrb[36].mxu0 %vm266_vm3, %v767_v26  ;;  %1797 = vmatprep.mubr.msk.bf16.mxu1 %vm1970_vm1, %v1969_v0  ;;  %v1241_v26 = vshll.u32 %v1960_v23, 16 }
  0x64   : > { %1815 = vmatprep.mubr.msk.bf16.mxu0 %vm1970_vm1, %v1969_v0 }
  0x65   : > { %v1243_v34 = vrot.slane %v1241_v26, 3 }
  0x67   : > { %v1244_v36 = vor.u32 %v1243_v34, %v1240_v33 }
  0x6a   : > { %1798 = vmatmul.mubr.msk.bf16.gmra.mrb[40].mxu1 %vm266_vm3, %v625_v40 }
  0x6b   : > { %1816 = vmatmul.mubr.msk.bf16.gmra.mrb[40].mxu0 %vm266_vm3, %v776_v55  ;;  %1801 = vmatprep.mubr.msk.bf16.mxu1 %vm1970_vm1, %v1969_v0  ;;  %v1245_v55 = vsel %vm1192_vm6, %v1235_v53, %v1244_v36 }
  0x6c   : > { %1819 = vmatprep.mubr.msk.bf16.mxu0 %vm1970_vm1, %v1969_v0 }
  0x72   : > { %1802 = vmatmul.mubr.msk.bf16.gmra.mrb[44].mxu1 %vm266_vm3, %v2094_v49  ;;  %v1954_v49 = vld [vmem:[%s2451_s1 + $0x40] sm:$0x3f]  }
  0x73   : > { %1820 = vmatmul.mubr.msk.bf16.gmra.mrb[44].mxu0 %vm266_vm3, %v785_v43  ;;  %1829 = vmatprep.mubr.msk.bf16.mxu1 %vm1970_vm1, %v1969_v0  ;;  %v1392_v47 = vsel %vm282_vm0, %v1954_v49, 0 }
  0x74   : > { %1823 = vmatprep.mubr.msk.bf16.mxu0 %vm1970_vm1, %v1969_v0 }
  0x7a   : > { %1830 = vmatmul.mubr.msk.bf16.vlgmr.msra.gmra.mrb[48].mxu1 %vm266_vm3, %v2145_v15  ;;  %v1194_v15 = vshrl.u32 %v2133_v7, 16 }
  0x7b   : > { %1824 = vmatmul.mubr.msk.bf16.gmra.mrb[48].mxu0 %vm266_vm3, %v794_v46  ;;  %1872 = vmatpush3.bf16.msra.mxu1 %v1267_v10 }
  0x7c   : > { %1851 = vmatprep.mubr.msk.bf16.mxu0 %vm1970_vm1, %v1969_v0  ;;  %1833 = vmatprep.mubr.msk.bf16.mxu1 %vm1970_vm1, %v1969_v0 }
  0x82   : > { %1834 = vmatmul.mubr.msk.bf16.gmra.mrb[52].mxu1 %vm266_vm3, %v2148_v16  ;;  %v1197_v16 = vshll.u32 %v2133_v7, 16 }
  0x83   : > { %1852 = vmatmul.mubr.msk.bf16.vlgmr.msra.gmra.mrb[52].mxu0 %vm266_vm3, %v2159_v5  ;;  %1837 = vmatprep.mubr.msk.bf16.mxu1 %vm1970_vm1, %v1969_v0  ;;  %v1205_v5 = vshll.u32 %v2105_v54, 16 }
  0x84   : > { %1894 = vmatpush3.bf16.msra.mxu0 %v1392_v47  ;;  %1855 = vmatprep.mubr.msk.bf16.mxu0 %vm1970_vm1, %v1969_v0  ;;  %v1199_v50 = vrot.slane %v1197_v16, 3 }
  0x85   : > { %v1207_v20 = vrot.slane %v1205_v5, 3 }
  0x8a   : > { %1838 = vmatmul.mubr.msk.bf16.gmra.mrb[56].mxu1 %vm266_vm3, %v2154_v18  ;;  %v1202_v18 = vshrl.u32 %v2105_v54, 16  ;;  %v1363_v54 = vrot.slane %v2119_v62, 3  ;;  %v1365_v62 = vrot.slane %v2122_v63, 3  ;;  %v1367_v63 = vrot.slane %v2140_v14, 3 }
  0x8b   : > { %1856 = vmatmul.mubr.msk.bf16.gmra.mrb[56].mxu0 %vm266_vm3, %v2166_v25  ;;  %1841 = vmatprep.mubr.msk.bf16.mxu1 %vm1970_vm1, %v1969_v0  ;;  %v1196_v25 = vrot.slane %v1194_v15, 2 }
  0x8c   : > { %1859 = vmatprep.mubr.msk.bf16.mxu0 %vm1970_vm1, %v1969_v0  ;;  %v1364_v17 = vsel %vm1359_vm7, %v1361_v11, %v1363_v54  ;;  %v1366_v27 = vsel %vm1359_vm7, %v1363_v54, %v1365_v62  ;;  %v1368_v37 = vsel %vm1359_vm7, %v1365_v62, %v1367_v63  ;;  %v1370_v14 = vsel %vm1359_vm7, %v1367_v63, %v1369_v6 }
  0x8d   : > { %v1200_v7 = vor.u32 %v1199_v50, %v1196_v25 }
  0x92   : > { %1842 = vmatmul.mubr.msk.bf16.gmra.mrb[60].mxu1 %vm266_vm3, %v2171_v28  ;;  %v1352_v28 = vld [vmem:[%s2017_s19 + $0x8] sm:$0x8] }
  0x93   : > { %1860 = vmatmul.mubr.msk.bf16.gmra.mrb[60].mxu0 %vm266_vm3, %v2174_v29  ;;  %1845 = vmatprep.mubr.msk.bf16.mxu1 %vm1970_vm1, %v1969_v0  ;;  %v1204_v29 = vrot.slane %v1202_v18, 2  ;;  %v1653_v57 = vcombine.low %v1352_v28, %v2114_v59  ;;  %v1217_v59 = vor.u32 %v1216_v60, %v1213_v58 }
  0x94   : > { %1863 = vmatprep.mubr.msk.bf16.mxu0 %vm1970_vm1, %v1969_v0 }
  0x95   : > { %v1208_v51 = vor.u32 %v1207_v20, %v1204_v29  ;;  %v1227_v19 = vsel %vm1192_vm6, %v1217_v59, %v1226_v8 }
  0x9a   : > { %1846 = vmatmul.mubr.msk.bf16.gmra.mrb[64].mxu1 %vm266_vm3, %v2177_v30  ;;  %v1360_v30 = vrot.slane %v1653_v57, 3 }
  0x9b   : > { %1864 = vmatmul.mubr.msk.bf16.gmra.mrb[64].mxu0 %vm266_vm3, %v2181_v32  ;;  %1873 = vmatprep.mubr.msk.bf16.mxu1 %vm1970_vm1, %v1969_v0  ;;  %v1209_v32 = vsel %vm1192_vm6, %v1200_v7, %v1208_v51 }
  0x9c   : > { %1867 = vmatprep.mubr.msk.bf16.mxu0 %vm1970_vm1, %v1969_v0  ;;  %v1362_v1 = vsel %vm1359_vm7, %v1360_v30, %v1361_v11 }
  0xa2   : > { %1874 = vmatmul.mubr.msk.bf16.vlgmr.msra.gmra.mrb[68].mxu1 %vm266_vm3, %v1209_v32 }
  0xa3   : > { %1868 = vmatmul.mubr.msk.bf16.gmra.mrb[68].mxu0 %vm266_vm3, %v2191_v35  ;;  %1877 = vmatprep.mubr.msk.bf16.mxu1 %vm1970_vm1, %v1969_v0  ;;  %v1218_v35 = vsel %vm1192_vm6, %v1208_v51, %v1217_v59 }
  0xa4   : > { %1895 = vmatprep.mubr.msk.bf16.mxu0 %vm1970_vm1, %v1969_v0 }
  0xaa   : > { %1878 = vmatmul.mubr.msk.bf16.gmra.mrb[72].mxu1 %vm266_vm3, %v1218_v35 }
  0xab   : > { %1896 = vmatmul.mubr.msk.bf16.vlgmr.msra.gmra.mrb[72].mxu0 %vm266_vm3, %v1362_v1  ;;  %1881 = vmatprep.mubr.msk.bf16.mxu1 %vm1970_vm1, %v1969_v0 }
  0xac   : > { %1899 = vmatprep.mubr.msk.bf16.mxu0 %vm1970_vm1, %v1969_v0 }
  0xb2   : > { %1882 = vmatmul.mubr.msk.bf16.gmra.mrb[76].mxu1 %vm266_vm3, %v1227_v19 }
  0xb3   : > { %1900 = vmatmul.mubr.msk.bf16.gmra.mrb[76].mxu0 %vm266_vm3, %v1364_v17  ;;  %1885 = vmatprep.mubr.msk.bf16.mxu1 %vm1970_vm1, %v1969_v0 }
  0xb4   : > { %1903 = vmatprep.mubr.msk.bf16.mxu0 %vm1970_vm1, %v1969_v0 }
  0xba   : > { %1886 = vmatmul.mubr.msk.bf16.gmra.mrb[80].mxu1 %vm266_vm3, %v1236_v31 }
  0xbb   : > { %1904 = vmatmul.mubr.msk.bf16.gmra.mrb[80].mxu0 %vm266_vm3, %v1366_v27  ;;  %1889 = vmatprep.mubr.msk.bf16.mxu1 %vm1970_vm1, %v1969_v0 }
  0xbc   : > { %1907 = vmatprep.mubr.msk.bf16.mxu0 %vm1970_vm1, %v1969_v0 }
  0xc2   : > { %1890 = vmatmul.mubr.msk.bf16.gmra.mrb[84].mxu1 %vm266_vm3, %v1245_v55 }
  0xc3   : > { %1908 = vmatmul.mubr.msk.bf16.gmra.mrb[84].mxu0 %vm266_vm3, %v1368_v37 }
  0xc4   : > { %1911 = vmatprep.mubr.msk.bf16.mxu0 %vm1970_vm1, %v1969_v0 }
  0xcb   : > { %1912 = vmatmul.mubr.msk.bf16.gmra.mrb[88].mxu0 %vm266_vm3, %v1370_v14 }
  0xed   : > { %v344_v41 = vpop.f32.mrb[0].mxu1 }
  0xee   : > { %v320_v38 = vpop.f32.mrb[0].mxu0  ;;  %v1733_v43 = vpop.f32.mrb[1].mxu1 }
  0xef   : > { %v1721_v40 = vpop.f32.mrb[1].mxu0  ;;  %v347_v39 = vpop.f32.mrb[2].mxu1 }
  0xf0   : > { %v323_v12 = vpop.f32.mrb[2].mxu0  ;;  %v1734_v45 = vpop.f32.mrb[3].mxu1 }
  0xf1   : > { %v1722_v42 = vpop.f32.mrb[3].mxu0 }
  0xf5   : > { %v352_v10 = vpop.f32.mrb[4].mxu1 }
  0xf6   : > { %v328_v44 = vpop.f32.mrb[4].mxu0  ;;  %v1737_v49 = vpop.f32.mrb[5].mxu1 }
  0xf7   : > { %v1725_v2 = vpop.f32.mrb[5].mxu0  ;;  %v355_v47 = vpop.f32.mrb[6].mxu1 }
  0xf8   : > { %v331_v46 = vpop.f32.mrb[6].mxu0  ;;  %v1738_v15 = vpop.f32.mrb[7].mxu1 }
  0xf9   : > { %v1726_v0 = vpop.f32.mrb[7].mxu0 }
  0xfd   : > { %v411_v5 = vpop.f32.mrb[8].mxu1 }
  0xfe   : > { %v336_v16 = vpop.f32.mrb[8].mxu0  ;;  %v412_v50 = vadd.f32 %v411_v5, %v320_v38  ;;  %v1743_v29 = vpop.f32.mrb[9].mxu1 }
  0xff   : > { %v1729_v18 = vpop.f32.mrb[9].mxu0  ;;  %v414_v28 = vpop.f32.mrb[10].mxu1 }
 0x100   : > { %v339_v25 = vpop.f32.mrb[10].mxu0  ;;  %v415_v7 = vadd.f32 %v414_v28, %v323_v12  ;;  %v1744_v51 = vpop.f32.mrb[11].mxu1 }
 0x101   : > { %v1730_v20 = vpop.f32.mrb[11].mxu0 }
 0x105   : > { %v419_v32 = vpop.f32.mrb[12].mxu1 }
 0x106   : > { %v526_v52 = vpop.f32.mrb[12].mxu0  ;;  %v420_v60 = vadd.f32 %v419_v32, %v328_v44  ;;  %v1747_v30 = vpop.f32.mrb[13].mxu1 }
 0x107   : > { %v565_v56 = vadd.f32 %v526_v52, %v412_v50  ;;  %v1765_v57 = vpop.f32.mrb[13].mxu0  ;;  %v422_v48 = vpop.f32.mrb[14].mxu1 }
 0x108   : > { %v529_v58 = vpop.f32.mrb[14].mxu0  ;;  %v423_v61 = vadd.f32 %v422_v48, %v331_v46  ;;  %v1748_v1 = vpop.f32.mrb[15].mxu1 }
 0x109   : > { %v566_v11 = vadd.f32 %v529_v58, %v415_v7  ;;  %v1766_v59 = vpop.f32.mrb[15].mxu0 }
 0x10d   : > { %v427_v54 = vpop.f32.mrb[16].mxu1 }
 0x10e   : > { %v534_v35 = vpop.f32.mrb[16].mxu0  ;;  %v428_v9 = vadd.f32 %v427_v54, %v336_v16  ;;  %v1751_v13 = vpop.f32.mrb[17].mxu1 }
 0x10f   : > { %v567_v3 = vadd.f32 %v534_v35, %v420_v60  ;;  %v1769_v4 = vpop.f32.mrb[17].mxu0  ;;  %v430_v21 = vpop.f32.mrb[18].mxu1 }
 0x110   : > { %v537_v8 = vpop.f32.mrb[18].mxu0  ;;  %v431_v22 = vadd.f32 %v430_v21, %v339_v25  ;;  %v1752_v23 = vpop.f32.mrb[19].mxu1 }
 0x111   : > { %v568_v17 = vadd.f32 %v537_v8, %v423_v61  ;;  %v1770_v19 = vpop.f32.mrb[19].mxu0 }
 0x115   : > { %v435_v26 = vpop.f32.mrb[20].mxu1 }
 0x116   : > { %v542_v62 = vpop.f32.mrb[20].mxu0  ;;  %v436_v31 = vadd.f32 %v435_v26, %v344_v41  ;;  %v1755_v33 = vpop.f32.mrb[21].mxu1 }
 0x117   : > { %v569_v53 = vadd.f32 %v542_v62, %v428_v9  ;;  %v1773_v24 = vpop.f32.mrb[21].mxu0  ;;  %v438_v36 = vpop.f32.mrb[22].mxu1 }
 0x118   : > { %v545_v27 = vpop.f32.mrb[22].mxu0  ;;  %v439_v37 = vadd.f32 %v438_v36, %v347_v39  ;;  %v1756_v55 = vpop.f32.mrb[23].mxu1 }
 0x119   : > { %v570_v34 = vadd.f32 %v545_v27, %v431_v22  ;;  %v1774_v63 = vpop.f32.mrb[23].mxu0 }
 0x11d   : > { %v443_v40 = vpop.f32.mrb[24].mxu1 }
 0x11e   : > { %v550_v6 = vpop.f32.mrb[24].mxu0  ;;  %v444_v42 = vadd.f32 %v443_v40, %v352_v10  ;;  %v1759_v43 = vpop.f32.mrb[25].mxu1 }
 0x11f   : > { %v571_v14 = vadd.f32 %v550_v6, %v436_v31  ;;  %v1777_v38 = vpop.f32.mrb[25].mxu0  ;;  %v446_v2 = vpop.f32.mrb[26].mxu1 }
 0x120   : > { %v553_v12 = vpop.f32.mrb[26].mxu0  ;;  %v447_v46 = vadd.f32 %v446_v2, %v355_v47  ;;  %v1760_v0 = vpop.f32.mrb[27].mxu1 }
 0x121   : > { %v572_v45 = vadd.f32 %v553_v12, %v439_v37  ;;  %v1778_v44 = vpop.f32.mrb[27].mxu0 }
 0x125   : > { %v685_v16 = vpop.f32.mrb[28].mxu1 }
 0x126   : > { %v558_v49 = vpop.f32.mrb[28].mxu0  ;;  %v724_v5 = vadd.f32 %v685_v16, %v565_v56  ;;  %v1787_v39 = vpop.f32.mrb[29].mxu1 }
 0x127   : > { %v573_v41 = vadd.f32 %v558_v49, %v444_v42  ;;  %v1781_v15 = vpop.f32.mrb[29].mxu0  ;;  %v688_v29 = vpop.f32.mrb[30].mxu1 }
 0x128   : > { %v561_v18 = vpop.f32.mrb[30].mxu0  ;;  %v725_v20 = vadd.f32 %v688_v29, %v566_v11  ;;  %v1788_v28 = vpop.f32.mrb[31].mxu1 }
 0x129   : > { %v574_v25 = vadd.f32 %v561_v18, %v447_v46  ;;  %v1782_v50 = vpop.f32.mrb[31].mxu0 }
 0x12d   : > { %v693_v52 = vpop.f32.mrb[32].mxu1 }
 0x12e   : > { %v852_v7 = vpop.f32.mrb[32].mxu0  ;;  %v726_v32 = vadd.f32 %v693_v52, %v567_v3  ;;  %v1791_v47 = vpop.f32.mrb[33].mxu1 }
 0x12f   : > { %v891_v10 = vadd.f32 %v852_v7, %v724_v5  ;;  %v1809_v51 = vpop.f32.mrb[33].mxu0  ;;  %v696_v30 = vpop.f32.mrb[34].mxu1 }
 0x130   : > { %v855_v57 = vpop.f32.mrb[34].mxu0  ;;  %v727_v59 = vadd.f32 %v696_v30, %v568_v17  ;;  %v1792_v48 = vpop.f32.mrb[35].mxu1 }
 0x131   : > { %v892_v58 = vadd.f32 %v855_v57, %v725_v20  ;;  %v1810_v60 = vpop.f32.mrb[35].mxu0 }
 0x135   : > { %v701_v35 = vpop.f32.mrb[36].mxu1 }
 0x136   : > { %v860_v61 = vpop.f32.mrb[36].mxu0  ;;  %v728_v54 = vadd.f32 %v701_v35, %v569_v53  ;;  %v1795_v11 = vpop.f32.mrb[37].mxu1 }
 0x137   : > { %v893_v56 = vadd.f32 %v860_v61, %v726_v32  ;;  %v1813_v1 = vpop.f32.mrb[37].mxu0  ;;  %v704_v13 = vpop.f32.mrb[38].mxu1 }
 0x138   : > { %v863_v4 = vpop.f32.mrb[38].mxu0  ;;  %v729_v19 = vadd.f32 %v704_v13, %v570_v34  ;;  %v1796_v21 = vpop.f32.mrb[39].mxu1 }
 0x139   : > { %v894_v8 = vadd.f32 %v863_v4, %v727_v59  ;;  %v1814_v9 = vpop.f32.mrb[39].mxu0 }
 0x13d   : > { %v709_v62 = vpop.f32.mrb[40].mxu1 }
 0x13e   : > { %v868_v22 = vpop.f32.mrb[40].mxu0  ;;  %v730_v26 = vadd.f32 %v709_v62, %v571_v14  ;;  %v1799_v17 = vpop.f32.mrb[41].mxu1 }
 0x13f   : > { %v895_v3 = vadd.f32 %v868_v22, %v728_v54  ;;  %v1817_v23 = vpop.f32.mrb[41].mxu0  ;;  %v712_v33 = vpop.f32.mrb[42].mxu1 }
 0x140   : > { %v871_v24 = vpop.f32.mrb[42].mxu0  ;;  %v731_v63 = vadd.f32 %v712_v33, %v572_v45  ;;  %v1800_v36 = vpop.f32.mrb[43].mxu1 }
 0x141   : > { %v896_v27 = vadd.f32 %v871_v24, %v729_v19  ;;  %v1818_v31 = vpop.f32.mrb[43].mxu0 }
 0x145   : > { %v717_v6 = vpop.f32.mrb[44].mxu1 }
 0x146   : > { %v876_v37 = vpop.f32.mrb[44].mxu0  ;;  %v732_v40 = vadd.f32 %v717_v6, %v573_v41  ;;  %v1803_v34 = vpop.f32.mrb[45].mxu1 }
 0x147   : > { %v897_v53 = vadd.f32 %v876_v37, %v730_v26  ;;  %v1821_v55 = vpop.f32.mrb[45].mxu0  ;;  %v720_v43 = vpop.f32.mrb[46].mxu1 }
 0x148   : > { %v879_v38 = vpop.f32.mrb[46].mxu0  ;;  %v733_v44 = vadd.f32 %v720_v43, %v574_v25  ;;  %v1804_v2 = vpop.f32.mrb[47].mxu1 }
 0x149   : > { %v898_v12 = vadd.f32 %v879_v38, %v731_v63  ;;  %v1822_v42 = vpop.f32.mrb[47].mxu0 }
 0x14d   : > { %v977_v49 = vpop.f32.mrb[48].mxu1 }
 0x14e   : > { %v884_v46 = vpop.f32.mrb[48].mxu0  ;;  %v1016_v16 = vadd.f32 %v977_v49, %v891_v10  ;;  %v1831_v45 = vpop.f32.mrb[49].mxu1 }
 0x14f   : > { %v899_v14 = vadd.f32 %v884_v46, %v732_v40  ;;  %v1825_v0 = vpop.f32.mrb[49].mxu0  ;;  %v980_v39 = vpop.f32.mrb[50].mxu1 }
 0x150   : > { %v887_v15 = vpop.f32.mrb[50].mxu0  ;;  %v1017_v50 = vadd.f32 %v980_v39, %v892_v58  ;;  %v1832_v29 = vpop.f32.mrb[51].mxu1 }
 0x151   : > { %v900_v18 = vadd.f32 %v887_v15, %v733_v44  ;;  %v1826_v5 = vpop.f32.mrb[51].mxu0 }
 0x155   : > { %v985_v7 = vpop.f32.mrb[52].mxu1 }
 0x156   : > { %v1136_v20 = vpop.f32.mrb[52].mxu0  ;;  %v1018_v52 = vadd.f32 %v985_v7, %v893_v56  ;;  %v1835_v25 = vpop.f32.mrb[53].mxu1 }
 0x157   : > { %v1175_v41 = vadd.f32 %v1136_v20, %v1016_v16  ;;  %v1853_v28 = vpop.f32.mrb[53].mxu0  ;;  %v988_v47 = vpop.f32.mrb[54].mxu1 }
 0x158   : > { %v1139_v51 = vpop.f32.mrb[54].mxu0  ;;  %v1019_v60 = vadd.f32 %v988_v47, %v894_v8  ;;  %v1836_v30 = vpop.f32.mrb[55].mxu1 }
 0x159   : > { %v1176_v57 = vadd.f32 %v1139_v51, %v1017_v50  ;;  %v1854_v32 = vpop.f32.mrb[55].mxu0 }
 0x15d   : > { %v993_v61 = vpop.f32.mrb[56].mxu1 }
 0x15e   : > { %v1144_v59 = vpop.f32.mrb[56].mxu0  ;;  %v1020_v35 = vadd.f32 %v993_v61, %v895_v3  ;;  %v1839_v58 = vpop.f32.mrb[57].mxu1 }
 0x15f   : > { %v1177_v10 = vadd.f32 %v1144_v59, %v1018_v52  ;;  %v1857_v48 = vpop.f32.mrb[57].mxu0  ;;  %v996_v11 = vpop.f32.mrb[58].mxu1 }
 0x160   : > { %v1147_v1 = vpop.f32.mrb[58].mxu0  ;;  %v1021_v9 = vadd.f32 %v996_v11, %v896_v27  ;;  %v1840_v13 = vpop.f32.mrb[59].mxu1 }
 0x161   : > { %v1178_v4 = vadd.f32 %v1147_v1, %v1019_v60  ;;  %v1858_v54 = vpop.f32.mrb[59].mxu0 }
 0x165   : > { %v1001_v22 = vpop.f32.mrb[60].mxu1 }
 0x166   : > { %v1152_v19 = vpop.f32.mrb[60].mxu0  ;;  %v1022_v62 = vadd.f32 %v1001_v22, %v897_v53  ;;  %v1843_v8 = vpop.f32.mrb[61].mxu1 }
 0x167   : > { %v1179_v56 = vadd.f32 %v1152_v19, %v1020_v35  ;;  %v1861_v21 = vpop.f32.mrb[61].mxu0  ;;  %v1004_v17 = vpop.f32.mrb[62].mxu1 }
 0x168   : > { %v1155_v23 = vpop.f32.mrb[62].mxu0  ;;  %v1023_v31 = vadd.f32 %v1004_v17, %v898_v12  ;;  %v1844_v33 = vpop.f32.mrb[63].mxu1 }
 0x169   : > { %v1180_v24 = vadd.f32 %v1155_v23, %v1021_v9  ;;  %v1862_v26 = vpop.f32.mrb[63].mxu0 }
 0x16d   : > { %v1009_v37 = vpop.f32.mrb[64].mxu1 }
 0x16e   : > { %v1160_v63 = vpop.f32.mrb[64].mxu0  ;;  %v1024_v27 = vadd.f32 %v1009_v37, %v899_v14  ;;  %v1847_v6 = vpop.f32.mrb[65].mxu1 }
 0x16f   : > { %v2394_v3 = vadd.f32 %v1160_v63, %v1022_v62  ;;  %v1865_v36 = vpop.f32.mrb[65].mxu0  ;;  %v1012_v34 = vpop.f32.mrb[66].mxu1 }
 0x170   : > { %v1163_v55 = vpop.f32.mrb[66].mxu0  ;;  %v1025_v53 = vadd.f32 %v1012_v34, %v900_v18  ;;  %v1848_v42 = vpop.f32.mrb[67].mxu1  ;;  %v2406_v18 = vld [vmem:[%s2452_s2] ss:$0 sm:$0xff] }
 0x171   : > { %v2396_v38 = vadd.f32 %v1163_v55, %v1023_v31  ;;  %v1866_v40 = vpop.f32.mrb[67].mxu0 }
 0x175   : > { %v1303_v2 = vpop.f32.mrb[68].mxu1 }
 0x176   : > { %v1168_v43 = vpop.f32.mrb[68].mxu0  ;;  %v1342_v0 = vadd.f32 %v1303_v2, %v1175_v41  ;;  %v1875_v49 = vpop.f32.mrb[69].mxu1 }
 0x177   : > { %v2398_v44 = vadd.f32 %v1168_v43, %v1024_v27  ;;  %v1869_v12 = vpop.f32.mrb[69].mxu0  ;;  %v1306_v14 = vpop.f32.mrb[70].mxu1 }
 0x178   : > { %v1171_v46 = vpop.f32.mrb[70].mxu0  ;;  %v1343_v45 = vadd.f32 %v1306_v14, %v1176_v57  ;;  %v1876_v5 = vpop.f32.mrb[71].mxu1 }
 0x179   : > { %v2400_v15 = vadd.f32 %v1171_v46, %v1025_v53  ;;  %v1870_v16 = vpop.f32.mrb[71].mxu0 }
 0x17d   : > { %v1311_v20 = vpop.f32.mrb[72].mxu1 }
 0x17e   : > { %v1428_v39 = vpop.f32.mrb[72].mxu0  ;;  %v1344_v28 = vadd.f32 %v1311_v20, %v1177_v10  ;;  %v1879_v51 = vpop.f32.mrb[73].mxu1 }
 0x17f   : > { %v1467_v50 = vadd.f32 %v1428_v39, %v1342_v0  ;;  %v1897_v29 = vpop.f32.mrb[73].mxu0  ;;  %v1314_v57 = vpop.f32.mrb[74].mxu1 }
 0x180   : > { %v1431_v41 = vpop.f32.mrb[74].mxu0  ;;  %v1345_v32 = vadd.f32 %v1314_v57, %v1178_v4  ;;  %v1880_v60 = vpop.f32.mrb[75].mxu1 }
 0x181   : > { %v1484_v7 = vadd.f32 %v2406_v18, %v1467_v50  ;;  %v1468_v52 = vadd.f32 %v1431_v41, %v1343_v45  ;;  %v1898_v25 = vpop.f32.mrb[75].mxu0 }
 0x183   : > { %1495 = vst.msk [vmem:[%s2411_s16] sm:$0xff] %vm1494_vm8, %v1484_v7  ;;  %v1485_v47 = vadd.f32 %v2406_v18, %v1468_v52 }
 0x185   : > { %1496 = vst.msk [vmem:[%s2411_s16 + $0x8] sm:$0xff] %vm1494_vm8, %v1485_v47  ;;  %v1319_v10 = vpop.f32.mrb[76].mxu1 }
 0x186   : > { %v1436_v30 = vpop.f32.mrb[76].mxu0  ;;  %v1346_v1 = vadd.f32 %v1319_v10, %v1179_v56  ;;  %v1883_v58 = vpop.f32.mrb[77].mxu1 }
 0x187   : > { %v1469_v59 = vadd.f32 %v1436_v30, %v1344_v28  ;;  %v1901_v48 = vpop.f32.mrb[77].mxu0  ;;  %v1322_v9 = vpop.f32.mrb[78].mxu1 }
 0x188   : > { %v1439_v61 = vpop.f32.mrb[78].mxu0  ;;  %v1347_v4 = vadd.f32 %v1322_v9, %v1180_v24  ;;  %v1884_v19 = vpop.f32.mrb[79].mxu1 }
 0x189   : > { %v1486_v35 = vadd.f32 %v2406_v18, %v1469_v59  ;;  %v1470_v54 = vadd.f32 %v1439_v61, %v1345_v32  ;;  %v1902_v11 = vpop.f32.mrb[79].mxu0 }
 0x18b   : > { %1497 = vst.msk [vmem:[%s2411_s16 + $0x10] sm:$0xff] %vm1494_vm8, %v1486_v35  ;;  %v1487_v13 = vadd.f32 %v2406_v18, %v1470_v54 }
 0x18d   : > { %1498 = vst.msk [vmem:[%s2411_s16 + $0x18] sm:$0xff] %vm1494_vm8, %v1487_v13  ;;  %v1327_v56 = vpop.f32.mrb[80].mxu1 }
 0x18e   : > { %v1444_v21 = vpop.f32.mrb[80].mxu0  ;;  %v1348_v8 = vadd.f32 %v1327_v56, %v2394_v3  ;;  %v1887_v17 = vpop.f32.mrb[81].mxu1 }
 0x18f   : > { %v1471_v22 = vadd.f32 %v1444_v21, %v1346_v1  ;;  %v1905_v23 = vpop.f32.mrb[81].mxu0  ;;  %v1330_v63 = vpop.f32.mrb[82].mxu1 }
 0x190   : > { %v1447_v62 = vpop.f32.mrb[82].mxu0  ;;  %v1349_v24 = vadd.f32 %v1330_v63, %v2396_v38  ;;  %v1888_v37 = vpop.f32.mrb[83].mxu1 }
 0x191   : > { %v1488_v26 = vadd.f32 %v2406_v18, %v1471_v22  ;;  %v1472_v31 = vadd.f32 %v1447_v62, %v1347_v4  ;;  %v1906_v33 = vpop.f32.mrb[83].mxu0 }
 0x193   : > { %1499 = vst.msk [vmem:[%s2411_s16 + $0x20] sm:$0xff] %vm1494_vm8, %v1488_v26  ;;  %v1489_v36 = vadd.f32 %v2406_v18, %v1472_v31 }
 0x195   : > { %1500 = vst.msk [vmem:[%s2411_s16 + $0x28] sm:$0xff] %vm1494_vm8, %v1489_v36  ;;  %v1335_v6 = vpop.f32.mrb[84].mxu1 }
 0x196   : > { %v1452_v55 = vpop.f32.mrb[84].mxu0  ;;  %v1350_v34 = vadd.f32 %v1335_v6, %v2398_v44  ;;  %v1891_v42 = vpop.f32.mrb[85].mxu1 }
 0x197   : > { %v1473_v27 = vadd.f32 %v1452_v55, %v1348_v8  ;;  %v1909_v3 = vpop.f32.mrb[85].mxu0  ;;  %v1338_v38 = vpop.f32.mrb[86].mxu1 }
 0x198   : > { %v1455_v40 = vpop.f32.mrb[86].mxu0  ;;  %v1351_v2 = vadd.f32 %v1338_v38, %v2400_v15  ;;  %v1892_v0 = vpop.f32.mrb[87].mxu1 }
 0x199   : > { %v1490_v53 = vadd.f32 %v2406_v18, %v1473_v27  ;;  %v1474_v43 = vadd.f32 %v1455_v40, %v1349_v24  ;;  %v1910_v12 = vpop.f32.mrb[87].mxu0 }
 0x19b   : > { %1501 = vst.msk [vmem:[%s2411_s16 + $0x30] sm:$0xff] %vm1494_vm8, %v1490_v53  ;;  %v1491_v46 = vadd.f32 %v2406_v18, %v1474_v43 }
 0x19d   : > { %1502 = vst.msk [vmem:[%s2411_s16 + $0x38] sm:$0xff] %vm1494_vm8, %v1491_v46 }
 0x19e   : > { %v1460_v49 = vpop.f32.mrb[88].mxu0 }
 0x19f   : > { %v1475_v16 = vadd.f32 %v1460_v49, %v1350_v34  ;;  %v1913_v44 = vpop.f32.mrb[89].mxu0 }
 0x1a0   : > { %v1463_v14 = vpop.f32.mrb[90].mxu0 }
 0x1a1   : > { %v1492_v45 = vadd.f32 %v2406_v18, %v1475_v16  ;;  %v1476_v5 = vadd.f32 %v1463_v14, %v1351_v2  ;;  %v1914_v39 = vpop.f32.mrb[91].mxu0 }
 0x1a3   : > { %1503 = vst.msk [vmem:[%s2411_s16 + $0x40] sm:$0xff] %vm1494_vm8, %v1492_v45  ;;  %v1493_v50 = vadd.f32 %v2406_v18, %v1476_v5 }
 0x1a5   : > { %1504 = vst.msk [vmem:[%s2411_s16 + $0x48] sm:$0xff] %vm1494_vm8, %v1493_v50 }
 0x1a6 PF: > { %s13_s12 = sadd.s32 1, %s1967_s12  }
 0x1a7   : > { %p10_p4 = scmp.ge.s32.totalorder %s13_s12, 18  }
 0x1a9   :  { %12 = sbr.rel (!%p10_p4) target bundleno = 1 (0x1), region = 70 }

</bundles_post_ra>
